<compile_context>
chip_gen: v6e
topology: v6e:2x2x1
jax: 0.10.0
libtpu: 0.0.40
codegen_flags: <defaults>
</compile_context>

<pallas_src>
import functools

import jax
import jax.numpy as jnp
from jax.experimental import pallas as pl
from jax.experimental.pallas import tpu as pltpu


# ---------------------------------------------------------------------------
# Kernels
# ---------------------------------------------------------------------------
def _conv3x3_kernel(x_hbm, w_ref, b_ref, o_ref, xwin_ref, acc_ref, sem,
                    *, TH, W, Cin, TC, pool):
    """3x3 conv + bias + ReLU (+ optional fused 2x2 max-pool).

    x_hbm    : (N, H+2, W+2, Cin) padded input, left in HBM (pl.ANY)
    w_ref    : (9*Cin, TC) bf16 weight tile, rows ordered (dy, dx, ci)
    b_ref    : (1, TC) f32 bias tile
    o_ref    : (1, TH, W, TC)  or (1, TH//2, W//2, TC) when pool=True
    xwin_ref : VMEM (TH+2, W+2, Cin) bf16 scratch (manual halo DMA)
    acc_ref  : VMEM (TH*W, TC) f32 accumulator
    """
    n = pl.program_id(0)
    h = pl.program_id(2)

    # Manual DMA of the (TH+2)-row halo window for this row tile.
    cp = pltpu.make_async_copy(x_hbm.at[n, pl.ds(h * TH, TH + 2)],
                               xwin_ref, sem)
    cp.start()
    cp.wait()

    # One K = 3*Cin matmul per dy (dx taps merged along the channel axis).
    for dy in range(3):
        rows = xwin_ref[dy:dy + TH]                          # (TH, W+2, Cin)
        patch = jnp.concatenate(
            [rows[:, dx:dx + W, :] for dx in range(3)], axis=-1)
        patch = patch.reshape(TH * W, 3 * Cin)
        part = jnp.dot(patch, w_ref[dy * 3 * Cin:(dy + 1) * 3 * Cin, :],
                       preferred_element_type=jnp.float32)
        if dy == 0:
            acc_ref[...] = part
        else:
            acc_ref[...] += part

    y = jnp.maximum(acc_ref[...] + b_ref[...], 0.0)          # bias + ReLU (f32)

    if pool:
        # Fused 2x2 / stride-2 max-pool on the f32 tile before the store.
        y = y.reshape(TH // 2, 2, W // 2, 2, TC)
        y = jnp.maximum(y[:, 0], y[:, 1])                    # pool over rows
        y = jnp.maximum(y[:, :, 0, :], y[:, :, 1, :])        # pool over cols
        o_ref[...] = y.reshape(1, TH // 2, W // 2, TC).astype(o_ref.dtype)
    else:
        o_ref[...] = y.reshape(1, TH, W, TC).astype(o_ref.dtype)


def _conv_k27_kernel(x_ref, w_ref, b_ref, o_ref, *, TH, W):
    """First VGG layer (Cin=3): input is host-im2col'ed to K=27; one matmul."""
    p = x_ref[0].reshape(TH * W, x_ref.shape[-1])
    y = jnp.dot(p, w_ref[...], preferred_element_type=jnp.float32)
    y = jnp.maximum(y + b_ref[...], 0.0)
    o_ref[...] = y.reshape(1, TH, W, w_ref.shape[-1]).astype(o_ref.dtype)


# ---------------------------------------------------------------------------
# Wrappers
# ---------------------------------------------------------------------------
def _row_tile(h, w, pool):
    """Largest row tile ~<=256/W rows that divides H (and is even if pooling)."""
    t = min(h, max(2, 256 // max(w, 1)))
    while t > 1 and (h % t != 0 or (pool and t % 2 != 0)):
        t -= 1
    return max(t, 1)


def conv3x3_relu(x, w2, b2, cin, cout, pool):
    """x: (N,H,W,Cin) bf16, w2: (9*Cin,Cout) bf16, b2: (1,Cout) f32."""
    N, H, W, _ = x.shape
    if pool:
        assert H % 2 == 0 and W % 2 == 0
    TH = _row_tile(H, W, pool)
    TC = cout if cout < 128 else 128
    assert cout % TC == 0 and H % TH == 0

    xp = jnp.pad(x, ((0, 0), (1, 1), (1, 1), (0, 0)))        # halo padding (glue)
    Ho, Wo, THo = (H // 2, W // 2, TH // 2) if pool else (H, W, TH)

    kernel = functools.partial(_conv3x3_kernel, TH=TH, W=W, Cin=cin, TC=TC,
                               pool=pool)
    return pl.pallas_call(
        kernel,
        out_shape=jax.ShapeDtypeStruct((N, Ho, Wo, cout), jnp.bfloat16),
        grid=(N, cout // TC, H // TH),
        in_specs=[
            pl.BlockSpec(memory_space=pl.ANY),                     # x stays in HBM
            pl.BlockSpec((9 * cin, TC), lambda n, co, h: (0, co)),
            pl.BlockSpec((1, TC), lambda n, co, h: (0, co)),
        ],
        out_specs=pl.BlockSpec((1, THo, Wo, TC),
                               lambda n, co, h: (n, h, 0, co)),
        scratch_shapes=[
            pltpu.VMEM((TH + 2, W + 2, cin), jnp.bfloat16),
            pltpu.VMEM((TH * W, TC), jnp.float32),
            pltpu.SemaphoreType.DMA(()),
        ],
        compiler_params=pltpu.CompilerParams(
            dimension_semantics=("parallel", "parallel", "parallel"),
            vmem_limit_bytes=48 * 1024 * 1024,   # fits v7x's 64 MiB physical VMEM
        ),
    )(xp, w2, b2)


def conv3x3_relu_cin3(x, w27, b2):
    """First VGG layer (Cin=3): host im2col to (N,H,W,27) then one matmul."""
    N, H, W, _ = x.shape
    cout = w27.shape[1]
    xp = jnp.pad(x, ((0, 0), (1, 1), (1, 1), (0, 0)))
    patches = jnp.concatenate(
        [xp[:, dy:dy + H, dx:dx + W, :] for dy in range(3) for dx in range(3)],
        axis=-1)                                             # (N, H, W, 27)
    K = patches.shape[-1]
    TH = _row_tile(H, W, False)
    kernel = functools.partial(_conv_k27_kernel, TH=TH, W=W)
    return pl.pallas_call(
        kernel,
        out_shape=jax.ShapeDtypeStruct((N, H, W, cout), jnp.bfloat16),
        grid=(N, H // TH),
        in_specs=[
            pl.BlockSpec((1, TH, W, K), lambda n, h: (n, h, 0, 0)),
            pl.BlockSpec((K, cout), lambda n, h: (0, 0)),
            pl.BlockSpec((1, cout), lambda n, h: (0, 0)),
        ],
        out_specs=pl.BlockSpec((1, TH, W, cout), lambda n, h: (n, h, 0, 0)),
        compiler_params=pltpu.CompilerParams(
            dimension_semantics=("parallel", "parallel"),
            vmem_limit_bytes=48 * 1024 * 1024,
        ),
    )(patches, w27, b2)


# ---------------------------------------------------------------------------
# Parameters (deterministic synthetic He-normal init) & forward pass
# ---------------------------------------------------------------------------
_VGG_CFG = {
    "stage1": [(3, 64, False), (64, 64, True),
               (64, 128, False), (128, 128, True),
               (128, 256, False), (256, 256, False),
               (256, 256, False), (256, 256, True)],
    "stage2": [(256, 512, False), (512, 512, False),
               (512, 512, False), (512, 512, True)],
    "stage3": [(512, 512, False), (512, 512, False),
               (512, 512, False), (512, 512, True)],
}


def init_params(seed=0):
    key = jax.random.PRNGKey(seed)
    params = {}
    for stage, cfg in _VGG_CFG.items():
        layers = []
        for cin, cout, pool in cfg:
            key, kw, kb = jax.random.split(key, 3)
            w = (jax.random.normal(kw, (3, 3, cin, cout), jnp.float32)
                 * jnp.sqrt(2.0 / (9.0 * cin)))
            b = jax.random.normal(kb, (cout,), jnp.float32) * 0.01
            layers.append({
                "w": w.reshape(9 * cin, cout).astype(jnp.bfloat16),
                "b": b.reshape(1, cout),
                "cin": cin, "cout": cout, "pool": pool,
            })
        params[stage] = layers
    return params


def _run_stage(x, layers):
    for lyr in layers:
        if lyr["cin"] == 3:
            x = conv3x3_relu_cin3(x, lyr["w"], lyr["b"])
        else:
            x = conv3x3_relu(x, lyr["w"], lyr["b"],
                             lyr["cin"], lyr["cout"], lyr["pool"])
    return x


def vgg19_backbone_forward(x_nchw, params):
    x = jnp.transpose(x_nchw, (0, 2, 3, 1)).astype(jnp.bfloat16)   # NCHW -> NHWC
    x1 = _run_stage(x, params["stage1"])
    x2 = _run_stage(x1, params["stage2"])
    x3 = _run_stage(x2, params["stage3"])
    to_nchw = lambda t: jnp.transpose(t, (0, 3, 1, 2)).astype(jnp.float32)
    return [to_nchw(x1), to_nchw(x2), to_nchw(x3)]


# ---------------------------------------------------------------------------
# Plain-XLA reference for the unit checks
# ---------------------------------------------------------------------------
def _ref_conv(x, w2, b2, cin, cout, pool):
    xf = x.astype(jnp.float32)
    wf = w2.astype(jnp.float32).reshape(3, 3, cin, cout)
    y = jax.lax.conv_general_dilated(
        xf, wf, window_strides=(1, 1), padding=((1, 1), (1, 1)),
        dimension_numbers=("NHWC", "HWIO", "NHWC"))
    y = jnp.maximum(y + b2.reshape(1, 1, 1, cout), 0.0)
    if pool:
        N, H, W, C = y.shape
        y = y.reshape(N, H // 2, 2, W // 2, 2, C).max(axis=(2, 4))
    return y.astype(jnp.bfloat16)


def _max_err(a, b):
    return float(jnp.max(jnp.abs(a.astype(jnp.float32) - b.astype(jnp.float32))))


# ---------------------------------------------------------------------------
if __name__ == "__main__":
    params = init_params(seed=0)

    # --- unit checks of the Pallas kernels against plain XLA ----------------
    k1, k2, k3, kx = jax.random.split(jax.random.PRNGKey(0), 4)

    # first layer (Cin=3, im2col K=27 path)
    x0 = jax.random.normal(k1, (2, 16, 16, 3), jnp.float32).astype(jnp.bfloat16)
    w0 = (jax.random.normal(k2, (3, 3, 3, 64), jnp.float32)
          * jnp.sqrt(2.0 / 27.0)).reshape(27, 64).astype(jnp.bfloat16)
    b0 = (jax.random.normal(k3, (64,), jnp.float32) * 0.01).reshape(1, 64)
    got = conv3x3_relu_cin3(x0, w0, b0)
    want = _ref_conv(x0, w0, b0, 3, 64, False)
    assert _max_err(got, want) < 0.1

    # general conv: exercises Cout tiling, row tiling and the fused pool
    for (cin, cout, pool) in [(64, 128, False), (64, 256, True)]:
        ka, kb, kc, kx = jax.random.split(kx, 4)
        xt = jax.random.normal(ka, (2, 32, 32, cin),
                               jnp.float32).astype(jnp.bfloat16)
        w2 = (jax.random.normal(kb, (3, 3, cin, cout), jnp.float32)
              * jnp.sqrt(2.0 / (9.0 * cin))).reshape(9 * cin, cout
                                                     ).astype(jnp.bfloat16)
        b2 = (jax.random.normal(kc, (cout,), jnp.float32) * 0.01).reshape(1, cout)
        got = conv3x3_relu(xt, w2, b2, cin, cout, pool)
        want = _ref_conv(xt, w2, b2, cin, cout, pool)
        assert _max_err(got, want) < 0.1

    # --- full backbone forward (matches VGG19_backbone.forward: [x1,x2,x3]) -
    x = jax.random.normal(jax.random.PRNGKey(0), (2, 3, 32, 32), jnp.float32)
    outs = vgg19_backbone_forward(x, params)
    outs = jax.block_until_ready(outs)

    x1, x2, x3 = outs
    assert x1.shape == (2, 256, 4, 4), x1.shape
    assert x2.shape == (2, 512, 2, 2), x2.shape
    assert x3.shape == (2, 512, 1, 1), x3.shape
    assert all(bool(jnp.all(jnp.isfinite(o))) for o in outs)

    print("KERNEL_OK")
</pallas_src>

<mosaic_0001>
module attributes {stable_mosaic.version = 11 : i64} {
  func.func @_conv_k27_kernel(%arg0: i32, %arg1: i32, %arg2: memref<1x16x16x27xbf16, #tpu.memory_space<vmem>>, %arg3: memref<27x64xbf16, #tpu.memory_space<vmem>>, %arg4: memref<1x64xf32, #tpu.memory_space<vmem>>, %arg5: memref<1x16x16x64xbf16, #tpu.memory_space<vmem>>) attributes {dimension_semantics = [#tpu.dimension_semantics<parallel>, #tpu.dimension_semantics<parallel>], iteration_bounds = array<i64: 2, 1>, scalar_prefetch = 0 : i64, scratch_operands = 0 : i64, tpu.core_type = #tpu.core_type<tc>, window_params = [{transform_indices = @transform_0, window_bounds = array<i64: 1, 16, 16, 27>}, {pipeline_mode = #tpu.pipeline_mode<synchronous>, transform_indices = @transform_1, window_bounds = array<i64: 27, 64>}, {pipeline_mode = #tpu.pipeline_mode<synchronous>, transform_indices = @transform_2, window_bounds = array<i64: 1, 64>}, {transform_indices = @transform_3, window_bounds = array<i64: 1, 16, 16, 64>}]} {
    %c0 = arith.constant 0 : index
    %c0_0 = arith.constant 0 : index
    %c0_1 = arith.constant 0 : index
    %c0_2 = arith.constant 0 : index
    %0 = vector.load %arg2[%c0, %c0_0, %c0_1, %c0_2] : memref<1x16x16x27xbf16, #tpu.memory_space<vmem>>, vector<1x16x16x27xbf16>
    %1 = vector.shape_cast %0 : vector<1x16x16x27xbf16> to vector<16x16x27xbf16>
    %2 = vector.shape_cast %1 : vector<16x16x27xbf16> to vector<256x27xbf16>
    %c0_3 = arith.constant 0 : index
    %c0_4 = arith.constant 0 : index
    %3 = vector.load %arg3[%c0_3, %c0_4] : memref<27x64xbf16, #tpu.memory_space<vmem>>, vector<27x64xbf16>
    %cst = arith.constant dense<0.000000e+00> : vector<256x64xf32>
    %4 = tpu.matmul %2, %3, %cst {dimension_numbers = #tpu.dot_dimension_numbers<[1], [0], [0], [1], [0, 0, 1, 1], [], []>} : vector<256x27xbf16>, vector<27x64xbf16>, vector<256x64xf32> -> vector<256x64xf32>
    %c0_5 = arith.constant 0 : index
    %c0_6 = arith.constant 0 : index
    %5 = vector.load %arg4[%c0_5, %c0_6] : memref<1x64xf32, #tpu.memory_space<vmem>>, vector<1x64xf32>
    %6 = vector.broadcast %5 : vector<1x64xf32> to vector<256x64xf32>
    %7 = arith.addf %4, %6 : vector<256x64xf32>
    %cst_7 = arith.constant 0.000000e+00 : f32
    %8 = vector.broadcast %cst_7 : f32 to vector<256x64xf32>
    %9 = arith.maximumf %7, %8 : vector<256x64xf32>
    %10 = vector.shape_cast %9 : vector<256x64xf32> to vector<1x16x16x64xf32>
    %11 = arith.truncf %10 : vector<1x16x16x64xf32> to vector<1x16x16x64xbf16>
    %c0_8 = arith.constant 0 : index
    %c0_9 = arith.constant 0 : index
    %c0_10 = arith.constant 0 : index
    %c0_11 = arith.constant 0 : index
    %12 = vector.load %arg5[%c0_8, %c0_9, %c0_10, %c0_11] : memref<1x16x16x64xbf16, #tpu.memory_space<vmem>>, vector<1x16x16x64xbf16>
    tpu.vector_store %arg5[%c0_8, %c0_9, %c0_10, %c0_11], %11 {strides = array<i32>} : memref<1x16x16x64xbf16, #tpu.memory_space<vmem>>, vector<1x16x16x64xbf16>,
    return
  }
  func.func @transform_0(%arg0: i32, %arg1: i32) -> (i32, i32, i32, i32) {
    %c0_i32 = arith.constant 0 : i32
    %c0_i32_0 = arith.constant 0 : i32
    %c0_i32_1 = arith.constant 0 : i32
    return %arg0, %arg1, %c0_i32, %c0_i32_0 : i32, i32, i32, i32
  }
  func.func @transform_1(%arg0: i32, %arg1: i32) -> (i32, i32) {
    %c0_i32 = arith.constant 0 : i32
    %c0_i32_0 = arith.constant 0 : i32
    %c0_i32_1 = arith.constant 0 : i32
    return %c0_i32, %c0_i32_0 : i32, i32
  }
  func.func @transform_2(%arg0: i32, %arg1: i32) -> (i32, i32) {
    %c0_i32 = arith.constant 0 : i32
    %c0_i32_0 = arith.constant 0 : i32
    %c0_i32_1 = arith.constant 0 : i32
    return %c0_i32, %c0_i32_0 : i32, i32
  }
  func.func @transform_3(%arg0: i32, %arg1: i32) -> (i32, i32, i32, i32) {
    %c0_i32 = arith.constant 0 : i32
    %c0_i32_0 = arith.constant 0 : i32
    %c0_i32_1 = arith.constant 0 : i32
    return %arg0, %arg1, %c0_i32, %c0_i32_0 : i32, i32, i32, i32
  }
}

</mosaic_0001>

<bundles_post_ra>
// kernel: tpu_custom_call.1
= control target key start
LH: loop header
LB: loop body
LE: loop exit
PB: predicated region body
PF: predicated region fallthrough
CT: control target
= control target key end

     0   :  { %8 = vsyncpa [#allocation3], 0  ;;  %s1653_s0 = inlined_call_operand.hbm [shape: bf16[2,16,16,27], index: 0, kind: input, shape index: {}]   ;;  %s1654_s1 = inlined_call_operand.hbm [shape: bf16[27,64], index: 1, kind: input, shape index: {}]   ;;  %s1655_s2 = inlined_call_operand.vmem [shape: f32[1,64], index: 2, kind: input, shape index: {}]   ;;  %s1656_s3 = inlined_call_operand.hbm [shape: bf16[2,16,16,64], index: 3, kind: output, shape index: {}]  }
   0x1   :  { %10 = vsyncpa [#allocation3 + $0x1], 0 }
   0x2   :  { %11 = vsyncpa [#allocation6], 0 }
   0x3   :  { %12 = vsyncpa [#allocation4], 0 }
   0x4   :  { %14 = vsyncpa [#allocation4 + $0x1], 0  ;;  %s1324_s12 = smov 0   ;;  %s1326_s13 = smov 0  }
   0x5   :  { %s1328_s14 = smov 0   ;;  %s1330_s15 = smov 0  }
   0x6   :  { %s1332_s16 = smov 0   ;;  %s1334_s17 = smov 0  }
   0x7 LB: > { %s884_s18 = sadd.s32 4294967295, %s1294_s17   ;;  %s885_s19 = sadd.s32 4294967294, %s1294_s17   ;;  %s1294_s17 = sphi %s1334_s17, %s20_s17   ;;  %s1290_s16 = sphi %s1332_s16, %s1678_s16   ;;  %s1286_s15 = sphi %s1330_s15, %s1677_s15   ;;  %s1282_s14 = sphi %s1328_s14, %s1676_s14   ;;  %s1278_s13 = sphi %s1326_s13, %s1675_s13   ;;  %s1274_s12 = sphi %s1324_s12, %s1674_s12  }
   0x8   : > { %p54_p0 = scmp.ne.s32.totalorder %s1278_s13, %s1274_s12  ;;  %p1358_p1 = scmp.eq.s32.totalorder %s884_s18, 0 }
   0x9   : > { %p1362_p2 = scmp.eq.s32.totalorder %s884_s18, 1  ;;  %p128_p3 = scmp.eq.s32.totalorder %s885_s19, 1 }
   0xa   : > { %p1368_p4 = por %p1358_p1, %p54_p0  ;;  %p886_p5 = scmp.ge.s32.totalorder %s1294_s17, 1 }
   0xb   : > { %p1373_p6 = por %p128_p3, %p54_p0  ;;  %p135_p7 = scmp.lt.s32.totalorder %s1294_s17, 3 }
   0xc   : > { %s1662_s22 = scalar_select %p1368_p4, 1, 0 }
   0xd   : > { %s1663_s23 = scalar_select %p1373_p6, 1, 0 }
   0xe   : > { %p1378_p8 = pnand %p886_p5, %p135_p7  ;;  %s1296_s25 = smov [#allocation5]  }
   0xf   : > { %s147_s26 = sshll.u32 %s1296_s25, 4  ;;  %s32_s28 = sadd.s32 1, %s1290_s16  ;;  %s148_s26 = int_to_ptr.vmem [resolvable:$true] %s147_s26 }
  0x10   : > { %p1068_p9 = pneg %p1378_p8  ;;  %s1167_s29 = scalar_lea.vmem %s148_s26, 256 }
  0x11   : > { %p1168_p13 = scmp.ne.s32.totalorder %s148_s26, %s1167_s29  ;;  %p1175_p5 = scmp.lt.s32.totalorder %s148_s26, %s148_s26 }
  0x12   : > { %p1387_p11 = pnand %p1068_p9, %p1358_p1  ;;  %p1176_p7 = scmp.lt.s32.totalorder %s1167_s29, %s1167_s29 }
  0x14   : > { %p1158_p12 = pneg %p1387_p11  ;;  %p1177_p6 = por %p1176_p7, %p1175_p5 }
  0x16   : > { %p1170_p0 = pnand %p1168_p13, %p1158_p12 }
  0x18   : > { %p1171_p3 = pneg %p1170_p0 }
  0x1a   : > { %p1178_p4 = pnand %p1177_p6, %p1171_p3 }
  0x1c   : > { %1181 = shalt.err (!%p1178_p4)
}
  0x1d   : > { %s1658_s30 = smov 64   ;;  %s1659_s4 = smov 4  }
  0x1e   : > { %1071 = dma.hbm_to_vmem [thread:$0]  (!%p1387_p11), %s1654_s1, 256, %s148_s26, [#allocation6], %s1658_s30, %s1658_s30, %s1659_s4  }
  0x1f   : > { %p34_p4 = scmp.ge.s32.totalorder %s32_s28, 2  ;;  %s41_s7 = sadd.s32 1, %s1282_s14 }
  0x20   : > { %p48_p6 = scmp.ne.s32.totalorder %s1282_s14, %s1278_s13  ;;  %p49_p9 = scmp.eq.s32.totalorder %s1294_s17, 0 }
  0x21   : > { %s1680_s28 = smov (%p34_p4, %s32_s28), 0  ;;  %p1081_p0 = scmp.lt.s32.totalorder %s1294_s17, 2 }
  0x22   : > { %p1408_p12 = por %p49_p9, %p48_p6  ;;  %p1414_p13 = por %p1362_p2, %p48_p6 }
  0x23   : > { %s36_s10 = ssub.s32 %s1290_s16, %s1680_s28  ;;  %s164_s11 = sand.u32 1, %s1282_s14  }
  0x24   : > { %p39_p11 = scmp.eq.s32.totalorder %s36_s10, 0  ;;  %s889_s18 = sshll.u32 %s164_s11, 7 }
  0x25   : > { %s968_s25 = sshll.u32 %s1290_s16, 11  ;;  %s168_s5 = scalar_lea.vmem [#allocation2], %s889_s18 }
  0x26   : > { %s1423_s19 = scalar_select %p39_p11, %s1282_s14, %s41_s7  }
  0x27   : > { %s177_s29 = scalar_lea.hbm %s1653_s0, %s968_s25  ;;  %s178_s6 = sshll.u32 %s168_s5, 4  ;;  %s179_s6 = int_to_ptr.vmem [resolvable:$true] %s178_s6 }
  0x28   : > { %p1431_p2 = pnand %p1081_p0, %p1408_p12  ;;  %s165_s30 = scalar_lea.sflag [#allocation3], %s164_s11 }
  0x29   : > { %s1195_s10 = scalar_lea.vmem %s179_s6, 2048  ;;  %s1299_s7 = smov [#allocation2]  }
  0x2a   : > { %p1184_p3 = pneg %p1431_p2  ;;  %p1196_p5 = scmp.ne.s32.totalorder %s179_s6, %s1195_s10 }
  0x2b   : > { %s1200_s4 = sshll.u32 %s1299_s7, 4  ;;  %s1201_s4 = int_to_ptr.vmem [resolvable:$false] %s1200_s4 }
  0x2c   : > { %p1198_p7 = pnand %p1196_p5, %p1184_p3  ;;  %s1202_s25 = scalar_lea.vmem %s1201_s4, 4096 }
  0x2d   : > { %p1203_p6 = scmp.lt.s32.totalorder %s179_s6, %s1201_s4  ;;  %p1204_p9 = scmp.lt.s32.totalorder %s1202_s25, %s1195_s10 }
  0x2e   : > { %p1199_p4 = pneg %p1198_p7 }
  0x2f   : > { %p1205_p11 = por %p1204_p9, %p1203_p6 }
  0x31   : > { %p1206_p10 = pnand %p1205_p11, %p1199_p4 }
  0x33   : > { %1209 = shalt.err (!%p1206_p10)
}
  0x34   : > { %s1669_s8 = smov 4   ;;  %s1670_s18 = smov 64  }
  0x35   : > { %1075 = dma.hbm_to_vmem [thread:$0]  (!%p1431_p2), %s177_s29, 2048, %s179_s6, %s165_s30, %s1670_s18, %s1670_s18, %s1669_s8  }
  0x36   : > { %190 = sbr.rel (%p1378_p8) target bundleno = 319 (0x13f), region = 32  ;;  %s1445_s11 = sand.u32 (!%p1378_p8), 1, %s1278_s13  }
  0x37   : > { %s893_s4 = sshll.u32 (!%p1378_p8), %s1445_s11, 7  ;;  %s193_s26 = scalar_lea.sflag (!%p1378_p8), [#allocation3], %s1445_s11 }
  0x38   : > { %s1451_s27 = scalar_lea.vmem (!%p1378_p8), [#allocation2], %s893_s4  ;;  %p1671_p10 = scmp.ne.s32.totalorder (!%p1378_p8), %s1662_s22, 0 }
  0x3b   : > { %1261 = dma.done.wait (%p1671_p10), %s193_s26, 2048  }
  0x3c   : > { %1263 = vsyncadd (%p1671_p10), %s193_s26, 4294965248 }
  0x3d   : > { %1265 = dma.done.wait (%p1358_p1), [#allocation6], 256  }
  0x3e   : > { %1267 = vsyncadd (%p1358_p1), [#allocation6], 4294967040  ;;  %vm409_vm0 = vcmask 1044480   ;;  %vm410_vm1 = vcmask 1045504   ;;  %v1300_v0 = vmov 65535   ;;  %v1139_v4 = vld [vmem:[#allocation5] sm:$0xff]  }
  0x3f   : > { %v411_v1 = vsel %vm409_vm0, 4294967295, %v1300_v0  ;;  %v1138_v3 = vld [vmem:[#allocation5 + $0x8] sm:$0x3f]   ;;  %v1140_v6 = vld [vmem:[%s1451_s27] sm:$0xff]   ;;  %vm360_vm2 = vcmask 220160   ;;  %v1144_v10 = vld [vmem:[%s1451_s27 + $0x10] sm:$0xff]  }
  0x40   : > { %v412_v2 = vsel %vm410_vm1, %v411_v1, 0  ;;  %v1141_v7 = vld [vmem:[%s1451_s27 + $0x40] sm:$0xff]   ;;  %v1142_v8 = vld [vmem:[%s1451_s27 + $0x8] sm:$0xff]   ;;  %1024 = vmatprep.mubr.msk.bf16.mxu0 %vm360_vm2, %v1140_v6  ;;  %v1145_v11 = vld [vmem:[%s1451_s27 + $0x50] sm:$0xff]   ;;  %vm737_vm3 = vcmask 519168   ;;  %s1506_s24 = scalar_lea.vmem [#allocation7], %s893_s4 }
  0x41   : > { %v414_v5 = vand.u32 %v1138_v3, %v412_v2  ;;  %1040 = vmatprep.mubr.msk.bf16.mxu1 %vm360_vm2, %v1141_v7  ;;  %v1143_v9 = vld [vmem:[%s1451_s27 + $0x48] sm:$0xff]   ;;  %v1146_v12 = vld [vmem:[%s1451_s27 + $0x18] sm:$0xff]   ;;  %v1148_v14 = vld [vmem:[%s1451_s27 + $0x20] sm:$0xff]   ;;  %s1001_s30 = sshll.u32 %s1286_s15, 11  ;;  %s787_s29 = sshll.u32 %s1506_s24, 4  ;;  %s1597_s29 = int_to_ptr.vmem [resolvable:$true] %s787_s29 }
  0x42   : > { %v1147_v13 = vld [vmem:[%s1451_s27 + $0x58] sm:$0xff]   ;;  %v1149_v15 = vld [vmem:[%s1451_s27 + $0x60] sm:$0xff]   ;;  %v1150_v16 = vld [vmem:[%s1451_s27 + $0x28] sm:$0xff]   ;;  %s1595_s21 = scalar_lea.hbm %s1656_s3, %s1001_s30  ;;  %s771_s15 = scalar_lea.sflag [#allocation4], %s1445_s11 }
  0x43   : > { %1020 = vmatprep.subr.bf16.mxu0 %v414_v5  ;;  %1056 = vmatprep.subr.bf16.mxu1 %v414_v5  ;;  %v1151_v17 = vld [vmem:[%s1451_s27 + $0x68] sm:$0xff]   ;;  %v1152_v18 = vld [vmem:[%s1451_s27 + $0x30] sm:$0xff]   ;;  %v1154_v20 = vld [vmem:[%s1451_s27 + $0x38] sm:$0xff]   ;;  %s1210_s10 = scalar_lea.vmem %s1597_s29, 2048  ;;  %s1301_s7 = smov [#allocation7]  }
  0x44   : > { %1021 = vmatpush3.bf16.msra.mxu0 %v414_v5  ;;  %1058 = vmatpush3.bf16.msra.mxu1 %v414_v5  ;;  %v1153_v19 = vld [vmem:[%s1451_s27 + $0x70] sm:$0xff]   ;;  %v1155_v21 = vld [vmem:[%s1451_s27 + $0x78] sm:$0xff]   ;;  %v1496_v22 = vld [vmem:[%s1655_s2] ss:$0 sm:$0xff]  ;;  %p1211_p1 = scmp.ne.s32.totalorder %s1597_s29, %s1210_s10  ;;  %s1214_s25 = sshll.u32 %s1301_s7, 4  ;;  %s1215_s25 = int_to_ptr.vmem [resolvable:$false] %s1214_s25 }
  0x45   : > { %1022 = vmatprep.subr.bf16.mxu0 %v1139_v4  ;;  %1057 = vmatprep.subr.bf16.mxu1 %v1139_v4  ;;  %s1216_s8 = scalar_lea.vmem %s1215_s25, 4096  ;;  %p1217_p0 = scmp.lt.s32.totalorder %s1597_s29, %s1215_s25 }
  0x46   : > { %p1212_p8 = pnand %p1211_p1, %p1414_p13  ;;  %p1218_p2 = scmp.lt.s32.totalorder %s1216_s8, %s1210_s10 }
  0x48   : > { %1023 = vmatpush3.bf16.msra.mxu0 %v1139_v4  ;;  %1059 = vmatpush3.bf16.msra.mxu1 %v1139_v4  ;;  %p1213_p12 = pneg %p1212_p8  ;;  %p1219_p3 = por %p1218_p2, %p1217_p0 }
  0x4a   : > { %p1220_p5 = pnand %p1219_p3, %p1213_p12 }
  0x4b   : > { %1025 = vmatmul.mubr.msk.bf16.vlgmr.msra.gmra.mxu0 %vm360_vm2, %v1142_v8  ;;  %1041 = vmatmul.mubr.msk.bf16.vlgmr.msra.gmra.mxu1 %vm360_vm2, %v1143_v9 }
  0x4c   : > { %1028 = vmatprep.mubr.msk.bf16.mxu0 %vm360_vm2, %v1144_v10  ;;  %1044 = vmatprep.mubr.msk.bf16.mxu1 %vm360_vm2, %v1145_v11 }
  0x53   : > { %1029 = vmatmul.mubr.msk.bf16.gmra.mxu0 %vm360_vm2, %v1146_v12  ;;  %1045 = vmatmul.mubr.msk.bf16.gmra.mxu1 %vm360_vm2, %v1147_v13 }
  0x54   : > { %1032 = vmatprep.mubr.msk.bf16.mxu0 %vm360_vm2, %v1148_v14  ;;  %1048 = vmatprep.mubr.msk.bf16.mxu1 %vm360_vm2, %v1149_v15 }
  0x5b   : > { %1033 = vmatmul.mubr.msk.bf16.gmra.mxu0 %vm360_vm2, %v1150_v16  ;;  %1049 = vmatmul.mubr.msk.bf16.gmra.mxu1 %vm360_vm2, %v1151_v17 }
  0x5c   : > { %1036 = vmatprep.mubr.msk.bf16.mxu0 %vm360_vm2, %v1152_v18  ;;  %1052 = vmatprep.mubr.msk.bf16.mxu1 %vm360_vm2, %v1153_v19 }
  0x63   : > { %1037 = vmatmul.mubr.msk.bf16.gmra.mxu0 %vm360_vm2, %v1154_v20  ;;  %1053 = vmatmul.mubr.msk.bf16.gmra.mxu1 %vm360_vm2, %v1155_v21 }
 0x10b   : > { %v1026_v23 = vpop.f32.mrf.mxu0  ;;  %v1042_v24 = vpop.f32.mrf.mxu1 }
 0x10c   : > { %v459_v25 = vadd.f32 %v1026_v23, %v1496_v22  ;;  %v523_v26 = vadd.f32 %v1042_v24, %v1496_v22 }
 0x10d   : > { %v450_v27 = vpop.f32.mrf.mxu0  ;;  %v514_v28 = vpop.f32.mrf.mxu1 }
 0x10e   : > { %v579_v29 = vmax.f32 %v459_v25, 0.0  ;;  %v595_v30 = vmax.f32 %v523_v26, 0.0  ;;  %v451_v31 = vadd.f32 %v1496_v22, %v450_v27  ;;  %v515_v32 = vadd.f32 %v1496_v22, %v514_v28 }
 0x10f   : > { %v1027_v33 = vpop.f32.mrf.mxu0  ;;  %v1043_v34 = vpop.f32.mrf.mxu1 }
 0x110   : > { %v971_v35 = vpack.c.bf16 %v579_v29, %v579_v29  ;;  %v987_v36 = vpack.c.bf16 %v595_v30, %v595_v30  ;;  %v577_v37 = vmax.f32 %v451_v31, 0.0  ;;  %v593_v38 = vmax.f32 %v515_v32, 0.0 }
 0x111   : > { %v462_v39 = vadd.f32 %v1027_v33, %v1496_v22  ;;  %v526_v40 = vadd.f32 %v1043_v34, %v1496_v22  ;;  %v453_v41 = vpop.f32.mrf.mxu0  ;;  %v517_v42 = vpop.f32.mrf.mxu1 }
 0x112   : > { %740 = vst.msk [vmem:[%s1506_s24 + $0x8] sm:$0xf] %vm737_vm3, %v971_v35  ;;  %756 = vst.msk [vmem:[%s1506_s24 + $0x48] sm:$0xf] %vm737_vm3, %v987_v36  ;;  %v969_v43 = vpack.c.bf16 %v577_v37, %v577_v37  ;;  %v985_v44 = vpack.c.bf16 %v593_v38, %v593_v38  ;;  %v454_v45 = vadd.f32 %v1496_v22, %v453_v41 }
 0x113   : > { %v518_v46 = vadd.f32 %v1496_v22, %v517_v42  ;;  %v580_v47 = vmax.f32 %v462_v39, 0.0  ;;  %v596_v48 = vmax.f32 %v526_v40, 0.0  ;;  %v1030_v49 = vpop.f32.mrf.mxu0  ;;  %v1046_v50 = vpop.f32.mrf.mxu1 }
 0x114   : > { %738 = vst.msk [vmem:[%s1506_s24] sm:$0xf] %vm737_vm3, %v969_v43  ;;  %754 = vst.msk [vmem:[%s1506_s24 + $0x40] sm:$0xf] %vm737_vm3, %v985_v44  ;;  %v578_v51 = vmax.f32 %v454_v45, 0.0  ;;  %v475_v53 = vadd.f32 %v1030_v49, %v1496_v22  ;;  %v539_v54 = vadd.f32 %v1046_v50, %v1496_v22 }
 0x115   : > { %v594_v52 = vmax.f32 %v518_v46, 0.0  ;;  %v972_v55 = vpack.c.bf16 %v580_v47, %v580_v47  ;;  %v988_v56 = vpack.c.bf16 %v596_v48, %v596_v48  ;;  %v466_v57 = vpop.f32.mrf.mxu0  ;;  %v530_v58 = vpop.f32.mrf.mxu1 }
 0x116   : > { %v970_v59 = vpack.c.bf16 %v578_v51, %v578_v51  ;;  %v583_v61 = vmax.f32 %v475_v53, 0.0  ;;  %v599_v62 = vmax.f32 %v539_v54, 0.0  ;;  %v467_v63 = vadd.f32 %v1496_v22, %v466_v57 }
 0x117   : > { %v986_v60 = vpack.c.bf16 %v594_v52, %v594_v52  ;;  %741 = vst.msk [vmem:[%s1506_s24 + $0xc] sm:$0xf] %vm737_vm3, %v972_v55  ;;  %757 = vst.msk [vmem:[%s1506_s24 + $0x4c] sm:$0xf] %vm737_vm3, %v988_v56  ;;  %v531_v0 = vadd.f32 %v1496_v22, %v530_v58  ;;  %v1031_v1 = vpop.f32.mrf.mxu0  ;;  %v1047_v2 = vpop.f32.mrf.mxu1 }
 0x118   : > { %739 = vst.msk [vmem:[%s1506_s24 + $0x4] sm:$0xf] %vm737_vm3, %v970_v59  ;;  %v975_v3 = vpack.c.bf16 %v583_v61, %v583_v61  ;;  %v991_v4 = vpack.c.bf16 %v599_v62, %v599_v62  ;;  %v478_v5 = vadd.f32 %v1031_v1, %v1496_v22  ;;  %v542_v6 = vadd.f32 %v1047_v2, %v1496_v22 }
 0x119   : > { %755 = vst.msk [vmem:[%s1506_s24 + $0x44] sm:$0xf] %vm737_vm3, %v986_v60  ;;  %v581_v7 = vmax.f32 %v467_v63, 0.0  ;;  %v597_v8 = vmax.f32 %v531_v0, 0.0  ;;  %v469_v9 = vpop.f32.mrf.mxu0  ;;  %v533_v10 = vpop.f32.mrf.mxu1 }
 0x11a   : > { %744 = vst.msk [vmem:[%s1506_s24 + $0x18] sm:$0xf] %vm737_vm3, %v975_v3  ;;  %760 = vst.msk [vmem:[%s1506_s24 + $0x58] sm:$0xf] %vm737_vm3, %v991_v4  ;;  %v584_v11 = vmax.f32 %v478_v5, 0.0  ;;  %v600_v12 = vmax.f32 %v542_v6, 0.0  ;;  %v470_v13 = vadd.f32 %v1496_v22, %v469_v9  ;;  %v534_v14 = vadd.f32 %v1496_v22, %v533_v10 }
 0x11b   : > { %v973_v15 = vpack.c.bf16 %v581_v7, %v581_v7  ;;  %v989_v16 = vpack.c.bf16 %v597_v8, %v597_v8  ;;  %v1034_v17 = vpop.f32.mrf.mxu0  ;;  %v1050_v18 = vpop.f32.mrf.mxu1 }
 0x11c   : > { %v976_v19 = vpack.c.bf16 %v584_v11, %v584_v11  ;;  %v992_v20 = vpack.c.bf16 %v600_v12, %v600_v12  ;;  %v582_v21 = vmax.f32 %v470_v13, 0.0  ;;  %v598_v23 = vmax.f32 %v534_v14, 0.0 }
 0x11d   : > { %742 = vst.msk [vmem:[%s1506_s24 + $0x10] sm:$0xf] %vm737_vm3, %v973_v15  ;;  %758 = vst.msk [vmem:[%s1506_s24 + $0x50] sm:$0xf] %vm737_vm3, %v989_v16  ;;  %v491_v24 = vadd.f32 %v1034_v17, %v1496_v22  ;;  %v555_v25 = vadd.f32 %v1050_v18, %v1496_v22  ;;  %v482_v26 = vpop.f32.mrf.mxu0  ;;  %v546_v27 = vpop.f32.mrf.mxu1 }
 0x11e   : > { %745 = vst.msk [vmem:[%s1506_s24 + $0x1c] sm:$0xf] %vm737_vm3, %v976_v19  ;;  %761 = vst.msk [vmem:[%s1506_s24 + $0x5c] sm:$0xf] %vm737_vm3, %v992_v20  ;;  %v974_v28 = vpack.c.bf16 %v582_v21, %v582_v21  ;;  %v990_v29 = vpack.c.bf16 %v598_v23, %v598_v23  ;;  %v483_v30 = vadd.f32 %v1496_v22, %v482_v26 }
 0x11f   : > { %v547_v31 = vadd.f32 %v1496_v22, %v546_v27  ;;  %v587_v32 = vmax.f32 %v491_v24, 0.0  ;;  %v603_v33 = vmax.f32 %v555_v25, 0.0  ;;  %v1035_v34 = vpop.f32.mrf.mxu0  ;;  %v1051_v35 = vpop.f32.mrf.mxu1 }
 0x120   : > { %743 = vst.msk [vmem:[%s1506_s24 + $0x14] sm:$0xf] %vm737_vm3, %v974_v28  ;;  %759 = vst.msk [vmem:[%s1506_s24 + $0x54] sm:$0xf] %vm737_vm3, %v990_v29  ;;  %v585_v36 = vmax.f32 %v483_v30, 0.0  ;;  %v494_v38 = vadd.f32 %v1035_v34, %v1496_v22  ;;  %v558_v39 = vadd.f32 %v1051_v35, %v1496_v22 }
 0x121   : > { %v601_v37 = vmax.f32 %v547_v31, 0.0  ;;  %v979_v40 = vpack.c.bf16 %v587_v32, %v587_v32  ;;  %v995_v41 = vpack.c.bf16 %v603_v33, %v603_v33  ;;  %v485_v42 = vpop.f32.mrf.mxu0  ;;  %v549_v43 = vpop.f32.mrf.mxu1 }
 0x122   : > { %v977_v44 = vpack.c.bf16 %v585_v36, %v585_v36  ;;  %v588_v46 = vmax.f32 %v494_v38, 0.0  ;;  %v604_v47 = vmax.f32 %v558_v39, 0.0  ;;  %v486_v48 = vadd.f32 %v1496_v22, %v485_v42 }
 0x123   : > { %v993_v45 = vpack.c.bf16 %v601_v37, %v601_v37  ;;  %748 = vst.msk [vmem:[%s1506_s24 + $0x28] sm:$0xf] %vm737_vm3, %v979_v40  ;;  %764 = vst.msk [vmem:[%s1506_s24 + $0x68] sm:$0xf] %vm737_vm3, %v995_v41  ;;  %v550_v49 = vadd.f32 %v1496_v22, %v549_v43  ;;  %v1038_v50 = vpop.f32.mrf.mxu0  ;;  %v1054_v51 = vpop.f32.mrf.mxu1 }
 0x124   : > { %746 = vst.msk [vmem:[%s1506_s24 + $0x20] sm:$0xf] %vm737_vm3, %v977_v44  ;;  %v980_v52 = vpack.c.bf16 %v588_v46, %v588_v46  ;;  %v996_v53 = vpack.c.bf16 %v604_v47, %v604_v47  ;;  %v507_v54 = vadd.f32 %v1038_v50, %v1496_v22  ;;  %v571_v55 = vadd.f32 %v1054_v51, %v1496_v22 }
 0x125   : > { %762 = vst.msk [vmem:[%s1506_s24 + $0x60] sm:$0xf] %vm737_vm3, %v993_v45  ;;  %v586_v56 = vmax.f32 %v486_v48, 0.0  ;;  %v602_v57 = vmax.f32 %v550_v49, 0.0  ;;  %v498_v58 = vpop.f32.mrf.mxu0  ;;  %v562_v59 = vpop.f32.mrf.mxu1 }
 0x126   : > { %749 = vst.msk [vmem:[%s1506_s24 + $0x2c] sm:$0xf] %vm737_vm3, %v980_v52  ;;  %765 = vst.msk [vmem:[%s1506_s24 + $0x6c] sm:$0xf] %vm737_vm3, %v996_v53  ;;  %v591_v60 = vmax.f32 %v507_v54, 0.0  ;;  %v607_v61 = vmax.f32 %v571_v55, 0.0  ;;  %v499_v62 = vadd.f32 %v1496_v22, %v498_v58  ;;  %v563_v63 = vadd.f32 %v1496_v22, %v562_v59 }
 0x127   : > { %v978_v0 = vpack.c.bf16 %v586_v56, %v586_v56  ;;  %v994_v1 = vpack.c.bf16 %v602_v57, %v602_v57  ;;  %v1039_v2 = vpop.f32.mrf.mxu0  ;;  %v1055_v3 = vpop.f32.mrf.mxu1 }
 0x128   : > { %v983_v4 = vpack.c.bf16 %v591_v60, %v591_v60  ;;  %v999_v5 = vpack.c.bf16 %v607_v61, %v607_v61  ;;  %v589_v6 = vmax.f32 %v499_v62, 0.0  ;;  %v605_v7 = vmax.f32 %v563_v63, 0.0 }
 0x129   : > { %747 = vst.msk [vmem:[%s1506_s24 + $0x24] sm:$0xf] %vm737_vm3, %v978_v0  ;;  %763 = vst.msk [vmem:[%s1506_s24 + $0x64] sm:$0xf] %vm737_vm3, %v994_v1  ;;  %v510_v8 = vadd.f32 %v1039_v2, %v1496_v22  ;;  %v574_v9 = vadd.f32 %v1055_v3, %v1496_v22  ;;  %v501_v10 = vpop.f32.mrf.mxu0  ;;  %v565_v11 = vpop.f32.mrf.mxu1 }
 0x12a   : > { %752 = vst.msk [vmem:[%s1506_s24 + $0x38] sm:$0xf] %vm737_vm3, %v983_v4  ;;  %768 = vst.msk [vmem:[%s1506_s24 + $0x78] sm:$0xf] %vm737_vm3, %v999_v5  ;;  %v981_v12 = vpack.c.bf16 %v589_v6, %v589_v6  ;;  %v997_v13 = vpack.c.bf16 %v605_v7, %v605_v7  ;;  %v502_v14 = vadd.f32 %v1496_v22, %v501_v10 }
 0x12b   : > { %v566_v15 = vadd.f32 %v1496_v22, %v565_v11  ;;  %v592_v16 = vmax.f32 %v510_v8, 0.0  ;;  %v608_v17 = vmax.f32 %v574_v9, 0.0 }
 0x12c   : > { %750 = vst.msk [vmem:[%s1506_s24 + $0x30] sm:$0xf] %vm737_vm3, %v981_v12  ;;  %766 = vst.msk [vmem:[%s1506_s24 + $0x70] sm:$0xf] %vm737_vm3, %v997_v13  ;;  %v590_v18 = vmax.f32 %v502_v14, 0.0 }
 0x12d   : > { %v606_v19 = vmax.f32 %v566_v15, 0.0  ;;  %v984_v20 = vpack.c.bf16 %v592_v16, %v592_v16  ;;  %v1000_v21 = vpack.c.bf16 %v608_v17, %v608_v17 }
 0x12e   : > { %v982_v22 = vpack.c.bf16 %v590_v18, %v590_v18 }
 0x12f   : > { %v998_v23 = vpack.c.bf16 %v606_v19, %v606_v19  ;;  %753 = vst.msk [vmem:[%s1506_s24 + $0x3c] sm:$0xf] %vm737_vm3, %v984_v20  ;;  %769 = vst.msk [vmem:[%s1506_s24 + $0x7c] sm:$0xf] %vm737_vm3, %v1000_v21 }
 0x130   : > { %751 = vst.msk [vmem:[%s1506_s24 + $0x34] sm:$0xf] %vm737_vm3, %v982_v22 }
 0x131   : > { %767 = vst.msk [vmem:[%s1506_s24 + $0x74] sm:$0xf] %vm737_vm3, %v998_v23 }
 0x132   : > { %1223 = shalt.err (!%p1220_p5)
}
 0x133   : > { %s1224_s18 = scalar_lea.hbm %s1595_s21, 2048  ;;  %s1228_s27 = scalar_lea.hbm %s1656_s3, 4096 }
 0x134   : > { %p1225_p7 = scmp.ne.s32.totalorder %s1595_s21, %s1224_s18  ;;  %p1229_p9 = scmp.lt.s32.totalorder %s1595_s21, %s1656_s3 }
 0x135   : > { %p1230_p11 = scmp.lt.s32.totalorder %s1228_s27, %s1224_s18 }
 0x136   : > { %p1226_p4 = pnand %p1225_p7, %p1414_p13 }
 0x137   : > { %p1231_p10 = por %p1230_p11, %p1229_p9 }
 0x138   : > { %p1227_p6 = pneg %p1226_p4 }
 0x13a   : > { %p1232_p1 = pnand %p1231_p10, %p1227_p6 }
 0x13c   : > { %1235 = shalt.err (!%p1232_p1)
}
 0x13d   : > { %s1302_s24 = smov 64   ;;  %s1303_s30 = smov 4  }
 0x13e   : > { %1066 = dma.vmem_to_hbm [thread:$0]  (%p1414_p13), %s1597_s29, 2048, %s1595_s21, %s771_s15, %s1302_s24, %s1302_s24, %s1303_s30  }
 0x13f PF: > { %s802_s5 = sand.u32 1, %s1274_s12   ;;  %p1672_p8 = scmp.ne.s32.totalorder %s1663_s23, 0 }
 0x140   : > { %p1673_p12 = scmp.ge.s32.totalorder %s1294_s17, 2  ;;  %s803_s6 = scalar_lea.sflag [#allocation4], %s802_s5 }
 0x142   : > { %p1077_p0 = pnand %p1673_p12, %p1672_p8 }
 0x144   : > { %p1078_p2 = pneg %p1077_p0 }
 0x146   : > { %1269 = dma.done.wait (%p1078_p2), %s803_s6, 2048  }
 0x147   : > { %1271 = vsyncadd (%p1078_p2), %s803_s6, 4294965248  ;;  %s20_s17 = sadd.s32 1, %s1294_s17   ;;  %s1674_s12 = smov %s1278_s13 }
 0x148   : > { %p17_p3 = scmp.ge.s32.totalorder %s20_s17, 4   ;;  %s1675_s13 = smov %s1282_s14 }
 0x149   : > { %s1676_s14 = smov %s1423_s19  ;;  %s1677_s15 = smov %s1290_s16 }
 0x14a   : > { %s1678_s16 = smov %s1680_s28  ;;  %19 = sbr.rel (!%p17_p3) target bundleno = 7 (0x7), region = 81 }
 0x14f   :  { %808 = vsyncpa [#allocation3], 1 }
 0x150   :  { %810 = vsyncpa [#allocation3 + $0x1], 1 }
 0x151   :  { %811 = vsyncpa [#allocation6], 1 }
 0x152   :  { %812 = vsyncpa [#allocation4], 1 }
 0x153   :  { %814 = vsyncpa [#allocation4 + $0x1], 1 }

</bundles_post_ra>
